<compile_context>
chip_gen: v7x
topology: tpu7x:2x2x1
jax: 0.10.0
libtpu: 0.0.40
codegen_flags: <defaults>
</compile_context>

<pallas_src>
import jax
import jax.numpy as jnp
import numpy as np
from jax.experimental import pallas as pl
from jax.experimental.pallas import tpu as pltpu

CP = 8  # padded channel count = f32 sublane-tile height


def _make_resblock_kernel(H, W, N):
    """Kernel factory; H, W, N are static Python ints."""
    NHW = N * H * W
    taps = [(dy, dx) for dy in (-1, 0, 1) for dx in (-1, 0, 1)]

    def kernel(x_ref, w1_ref, w2_ref, rc_ref, o_ref):
        x = x_ref[...]                    # (CP, NHW): rows 0..C-1 data, row C = 1.0, rest 0
        w1 = w1_ref[...]                  # (CP, 9*CP), bias folded in
        w2 = w2_ref[...]
        r = rc_ref[0:1, :]                # (1, NHW) row index within its image (f32)
        c = rc_ref[1:2, :]                # (1, NHW) col index within its image (f32)

        # Separable zero-'same'-padding validity masks, computed once per call
        # (6 compares total) and reused by both convs and all taps.
        rm = {-1: r >= 1.0, 0: None, 1: r <= float(H - 2)}
        cm = {-1: c >= 1.0, 0: None, 1: c <= float(W - 2)}

        def conv3x3(inp, w):
            # im2col patch matrix (9*CP, NHW).  Each tap piece is a full
            # (8, NHW) sublane tile -> the concat is a free vreg stack.
            # Neighbour taps come from XLU lane rolls; out-of-image (and
            # cross-image / wrapped) positions are zeroed by the masks.
            pieces = []
            for dy, dx in taps:
                s = dy * W + dx           # flattened neighbour offset
                if s == 0:
                    pieces.append(inp)
                    continue
                shifted = pltpu.roll(inp, (-s) % NHW, axis=1)   # inp[:, p + s]
                m = rm[dy]
                if cm[dx] is not None:
                    m = cm[dx] if m is None else (m & cm[dx])
                pieces.append(jnp.where(m, shifted, 0.0))
            patches = jnp.concatenate(pieces, axis=0)           # (72, NHW)
            # Single fused MXU matmul; bias rides in via the ones-carrier row.
            return jnp.dot(w, patches, preferred_element_type=jnp.float32)

        h = conv3x3(x, w1)                # rows 0..C-1 = conv1 + b1, row C = 1.0
        h = jnp.maximum(h, 0.2 * h)       # LeakyReLU(0.2); ones row stays 1.0
        y = conv3x3(h, w2)                # rows 0..C-1 = conv2 + b2
        o_ref[...] = (y + x).astype(o_ref.dtype)   # residual add (pad rows ignored)

    return kernel


def _prep_weight(w_oihw, b, propagate_ones):
    """OIHW conv weight + bias -> padded (CP, 9*CP) matmul weight.

    Patch-matrix row index is tap*CP + ci; bias sits in the column that
    multiplies the ones-carrier row (channel index Cin) of the centre tap.
    """
    Cout, Cin, KH, KW = w_oihw.shape
    w = jnp.transpose(w_oihw, (0, 2, 3, 1)).reshape(Cout, KH * KW, Cin)
    w = jnp.pad(w, ((0, 0), (0, 0), (0, CP - Cin)))            # (Cout, 9, CP)
    center = (KH // 2) * KW + (KW // 2)                        # tap index 4
    w = w.at[:, center, Cin].set(b)                            # fold bias
    w = w.reshape(Cout, KH * KW * CP)
    w = jnp.pad(w, ((0, CP - Cout), (0, 0)))                   # (CP, 9*CP)
    if propagate_ones:
        # Output row `Cin` reproduces the ones-carrier row so the *next*
        # conv's bias fold still works after the activation.
        w = w.at[Cout, center * CP + Cin].set(1.0)
    return w.astype(jnp.float32)


@jax.jit
def resblock_pallas(x_nchw, w1_oihw, b1, w2_oihw, b2):
    """x_nchw: (N, C, H, W); weights in PyTorch OIHW layout; biases (C,)."""
    N, C, H, W = x_nchw.shape
    assert C < CP, "need a spare padded channel row for the ones carrier"
    NHW = N * H * W

    # Batch folded onto the lane axis: (N, C, H, W) -> (CP, N*H*W).
    x_t = jnp.transpose(x_nchw, (1, 0, 2, 3)).reshape(C, NHW).astype(jnp.float32)
    x_pad = jnp.concatenate(
        [x_t,
         jnp.ones((1, NHW), jnp.float32),                      # ones carrier
         jnp.zeros((CP - C - 1, NHW), jnp.float32)], axis=0)   # (CP, NHW)

    w1 = _prep_weight(w1_oihw, b1, propagate_ones=True)
    w2 = _prep_weight(w2_oihw, b2, propagate_ones=False)

    # Per-lane (row, col) coordinates inside each image; the kernel derives
    # all 9 edge masks from these two rows (replaces the baked (9,1,HW) masks).
    rows = np.broadcast_to(np.arange(H).reshape(1, H, 1), (N, H, W)).reshape(NHW)
    cols = np.broadcast_to(np.arange(W).reshape(1, 1, W), (N, H, W)).reshape(NHW)
    rc = jnp.asarray(np.stack([rows, cols], axis=0), dtype=jnp.float32)  # (2, NHW)

    kernel = _make_resblock_kernel(H, W, N)

    # Grid-less call: whole (tiny) operands land in VMEM, one DMA each, one
    # kernel step.  (At production H/W/C: tile H with a 1-row halo, add an
    # even 'parallel' grid axis for v7x, and set vmem_limit_bytes.)
    out = pl.pallas_call(
        kernel,
        out_shape=jax.ShapeDtypeStruct((CP, NHW), jnp.float32),
    )(x_pad, w1, w2, rc)

    return out[:C].reshape(C, N, H, W).transpose(1, 0, 2, 3)


def _reference(x_nchw, w1_oihw, b1, w2_oihw, b2):
    """Pure-JAX reference (matches PyTorch Conv2d semantics)."""
    dn = jax.lax.conv_dimension_numbers(x_nchw.shape, w1_oihw.shape,
                                        ("NCHW", "OIHW", "NCHW"))

    def conv(x, w, b):
        y = jax.lax.conv_general_dilated(x, w, (1, 1), ((1, 1), (1, 1)),
                                         dimension_numbers=dn)
        return y + b.reshape(1, -1, 1, 1)

    h = conv(x_nchw, w1_oihw, b1)
    h = jnp.where(h > 0, h, 0.2 * h)
    h = conv(h, w2_oihw, b2)
    return h + x_nchw


if __name__ == "__main__":
    # Small shapes consistent with the module: nf=4, kernel_size=3.
    N, C, H, W = 2, 4, 16, 16
    K = 3

    key = jax.random.PRNGKey(0)
    kx, kw1, kb1, kw2, kb2 = jax.random.split(key, 5)

    x = jax.random.normal(kx, (N, C, H, W), jnp.float32)

    # Deterministic PyTorch-like init: U(-k, k), k = 1/sqrt(fan_in).
    fan_in = C * K * K
    bound = 1.0 / np.sqrt(fan_in)
    w1 = jax.random.uniform(kw1, (C, C, K, K), jnp.float32, -bound, bound)
    b1 = jax.random.uniform(kb1, (C,), jnp.float32, -bound, bound)
    w2 = jax.random.uniform(kw2, (C, C, K, K), jnp.float32, -bound, bound)
    b2 = jax.random.uniform(kb2, (C,), jnp.float32, -bound, bound)

    out = jax.block_until_ready(resblock_pallas(x, w1, b1, w2, b2))
    ref = jax.block_until_ready(_reference(x, w1, b1, w2, b2))

    assert out.shape == (N, C, H, W) and out.dtype == jnp.float32
    np.testing.assert_allclose(np.asarray(out), np.asarray(ref),
                               rtol=1e-4, atol=1e-5)
    print("KERNEL_OK")
</pallas_src>

<mosaic_0001>
module attributes {stable_mosaic.version = 11 : i64} {
  func.func @kernel(%arg0: memref<8x512xf32, #tpu.memory_space<vmem>>, %arg1: memref<8x72xf32, #tpu.memory_space<vmem>>, %arg2: memref<8x72xf32, #tpu.memory_space<vmem>>, %arg3: memref<2x512xf32, #tpu.memory_space<vmem>>, %arg4: memref<8x512xf32, #tpu.memory_space<vmem>>) attributes {dimension_semantics = [], scalar_prefetch = 0 : i64, scratch_operands = 0 : i64, tpu.core_type = #tpu.core_type<tc>} {
    %c0 = arith.constant 0 : index
    %c0_0 = arith.constant 0 : index
    %0 = vector.load %arg0[%c0, %c0_0] : memref<8x512xf32, #tpu.memory_space<vmem>>, vector<8x512xf32>
    %c0_1 = arith.constant 0 : index
    %c0_2 = arith.constant 0 : index
    %1 = vector.load %arg1[%c0_1, %c0_2] : memref<8x72xf32, #tpu.memory_space<vmem>>, vector<8x72xf32>
    %c0_3 = arith.constant 0 : index
    %c0_4 = arith.constant 0 : index
    %2 = vector.load %arg2[%c0_3, %c0_4] : memref<8x72xf32, #tpu.memory_space<vmem>>, vector<8x72xf32>
    %c0_5 = arith.constant 0 : index
    %c0_6 = arith.constant 0 : index
    %3 = vector.load %arg3[%c0_5, %c0_6] : memref<2x512xf32, #tpu.memory_space<vmem>>, vector<1x512xf32>
    %c1 = arith.constant 1 : index
    %c0_7 = arith.constant 0 : index
    %4 = vector.load %arg3[%c1, %c0_7] : memref<2x512xf32, #tpu.memory_space<vmem>>, vector<1x512xf32>
    %cst = arith.constant 1.000000e+00 : f32
    %5 = vector.broadcast %cst : f32 to vector<1x512xf32>
    %6 = arith.cmpf oge, %3, %5 : vector<1x512xf32>
    %cst_8 = arith.constant 1.400000e+01 : f32
    %7 = vector.broadcast %cst_8 : f32 to vector<1x512xf32>
    %8 = arith.cmpf ole, %3, %7 : vector<1x512xf32>
    %cst_9 = arith.constant 1.000000e+00 : f32
    %9 = vector.broadcast %cst_9 : f32 to vector<1x512xf32>
    %10 = arith.cmpf oge, %4, %9 : vector<1x512xf32>
    %cst_10 = arith.constant 1.400000e+01 : f32
    %11 = vector.broadcast %cst_10 : f32 to vector<1x512xf32>
    %12 = arith.cmpf ole, %4, %11 : vector<1x512xf32>
    %c17_i32 = arith.constant 17 : i32
    %13 = tpu.dynamic_rotate %0 by %c17_i32 dim 1 : vector<8x512xf32>, i32 -> vector<8x512xf32>
    %14 = arith.andi %6, %10 : vector<1x512xi1>
    %cst_11 = arith.constant 0.000000e+00 : f32
    %15 = vector.shape_cast %14 : vector<1x512xi1> to vector<1x512xi1>
    %16 = vector.broadcast %15 : vector<1x512xi1> to vector<8x512xi1>
    %17 = vector.broadcast %cst_11 : f32 to vector<8x512xf32>
    %18 = arith.select %16, %13, %17 : vector<8x512xi1>, vector<8x512xf32>
    %c16_i32 = arith.constant 16 : i32
    %19 = tpu.dynamic_rotate %0 by %c16_i32 dim 1 : vector<8x512xf32>, i32 -> vector<8x512xf32>
    %cst_12 = arith.constant 0.000000e+00 : f32
    %20 = vector.shape_cast %6 : vector<1x512xi1> to vector<1x512xi1>
    %21 = vector.broadcast %20 : vector<1x512xi1> to vector<8x512xi1>
    %22 = vector.broadcast %cst_12 : f32 to vector<8x512xf32>
    %23 = arith.select %21, %19, %22 : vector<8x512xi1>, vector<8x512xf32>
    %c15_i32 = arith.constant 15 : i32
    %24 = tpu.dynamic_rotate %0 by %c15_i32 dim 1 : vector<8x512xf32>, i32 -> vector<8x512xf32>
    %25 = arith.andi %6, %12 : vector<1x512xi1>
    %cst_13 = arith.constant 0.000000e+00 : f32
    %26 = vector.shape_cast %25 : vector<1x512xi1> to vector<1x512xi1>
    %27 = vector.broadcast %26 : vector<1x512xi1> to vector<8x512xi1>
    %28 = vector.broadcast %cst_13 : f32 to vector<8x512xf32>
    %29 = arith.select %27, %24, %28 : vector<8x512xi1>, vector<8x512xf32>
    %c1_i32 = arith.constant 1 : i32
    %30 = tpu.dynamic_rotate %0 by %c1_i32 dim 1 : vector<8x512xf32>, i32 -> vector<8x512xf32>
    %cst_14 = arith.constant 0.000000e+00 : f32
    %31 = vector.shape_cast %10 : vector<1x512xi1> to vector<1x512xi1>
    %32 = vector.broadcast %31 : vector<1x512xi1> to vector<8x512xi1>
    %33 = vector.broadcast %cst_14 : f32 to vector<8x512xf32>
    %34 = arith.select %32, %30, %33 : vector<8x512xi1>, vector<8x512xf32>
    %c511_i32 = arith.constant 511 : i32
    %35 = tpu.dynamic_rotate %0 by %c511_i32 dim 1 : vector<8x512xf32>, i32 -> vector<8x512xf32>
    %cst_15 = arith.constant 0.000000e+00 : f32
    %36 = vector.shape_cast %12 : vector<1x512xi1> to vector<1x512xi1>
    %37 = vector.broadcast %36 : vector<1x512xi1> to vector<8x512xi1>
    %38 = vector.broadcast %cst_15 : f32 to vector<8x512xf32>
    %39 = arith.select %37, %35, %38 : vector<8x512xi1>, vector<8x512xf32>
    %c497_i32 = arith.constant 497 : i32
    %40 = tpu.dynamic_rotate %0 by %c497_i32 dim 1 : vector<8x512xf32>, i32 -> vector<8x512xf32>
    %41 = arith.andi %8, %10 : vector<1x512xi1>
    %cst_16 = arith.constant 0.000000e+00 : f32
    %42 = vector.shape_cast %41 : vector<1x512xi1> to vector<1x512xi1>
    %43 = vector.broadcast %42 : vector<1x512xi1> to vector<8x512xi1>
    %44 = vector.broadcast %cst_16 : f32 to vector<8x512xf32>
    %45 = arith.select %43, %40, %44 : vector<8x512xi1>, vector<8x512xf32>
    %c496_i32 = arith.constant 496 : i32
    %46 = tpu.dynamic_rotate %0 by %c496_i32 dim 1 : vector<8x512xf32>, i32 -> vector<8x512xf32>
    %cst_17 = arith.constant 0.000000e+00 : f32
    %47 = vector.shape_cast %8 : vector<1x512xi1> to vector<1x512xi1>
    %48 = vector.broadcast %47 : vector<1x512xi1> to vector<8x512xi1>
    %49 = vector.broadcast %cst_17 : f32 to vector<8x512xf32>
    %50 = arith.select %48, %46, %49 : vector<8x512xi1>, vector<8x512xf32>
    %c495_i32 = arith.constant 495 : i32
    %51 = tpu.dynamic_rotate %0 by %c495_i32 dim 1 : vector<8x512xf32>, i32 -> vector<8x512xf32>
    %52 = arith.andi %8, %12 : vector<1x512xi1>
    %cst_18 = arith.constant 0.000000e+00 : f32
    %53 = vector.shape_cast %52 : vector<1x512xi1> to vector<1x512xi1>
    %54 = vector.broadcast %53 : vector<1x512xi1> to vector<8x512xi1>
    %55 = vector.broadcast %cst_18 : f32 to vector<8x512xf32>
    %56 = arith.select %54, %51, %55 : vector<8x512xi1>, vector<8x512xf32>
    %57 = tpu.concatenate %18, %23, %29, %34, %0, %39, %45, %50, %56 in 0 : vector<8x512xf32>, vector<8x512xf32>, vector<8x512xf32>, vector<8x512xf32>, vector<8x512xf32>, vector<8x512xf32>, vector<8x512xf32>, vector<8x512xf32>, vector<8x512xf32> -> vector<72x512xf32>
    %cst_19 = arith.constant dense<0.000000e+00> : vector<8x512xf32>
    %58 = tpu.matmul %1, %57, %cst_19 {dimension_numbers = #tpu.dot_dimension_numbers<[1], [0], [0], [1], [0, 0, 1, 1], [], []>} : vector<8x72xf32>, vector<72x512xf32>, vector<8x512xf32> -> vector<8x512xf32>
    %cst_20 = arith.constant 2.000000e-01 : f32
    %59 = vector.broadcast %cst_20 : f32 to vector<8x512xf32>
    %60 = arith.mulf %59, %58 : vector<8x512xf32>
    %61 = arith.maximumf %58, %60 : vector<8x512xf32>
    %c17_i32_21 = arith.constant 17 : i32
    %62 = tpu.dynamic_rotate %61 by %c17_i32_21 dim 1 : vector<8x512xf32>, i32 -> vector<8x512xf32>
    %63 = arith.andi %6, %10 : vector<1x512xi1>
    %cst_22 = arith.constant 0.000000e+00 : f32
    %64 = vector.shape_cast %63 : vector<1x512xi1> to vector<1x512xi1>
    %65 = vector.broadcast %64 : vector<1x512xi1> to vector<8x512xi1>
    %66 = vector.broadcast %cst_22 : f32 to vector<8x512xf32>
    %67 = arith.select %65, %62, %66 : vector<8x512xi1>, vector<8x512xf32>
    %c16_i32_23 = arith.constant 16 : i32
    %68 = tpu.dynamic_rotate %61 by %c16_i32_23 dim 1 : vector<8x512xf32>, i32 -> vector<8x512xf32>
    %cst_24 = arith.constant 0.000000e+00 : f32
    %69 = vector.shape_cast %6 : vector<1x512xi1> to vector<1x512xi1>
    %70 = vector.broadcast %69 : vector<1x512xi1> to vector<8x512xi1>
    %71 = vector.broadcast %cst_24 : f32 to vector<8x512xf32>
    %72 = arith.select %70, %68, %71 : vector<8x512xi1>, vector<8x512xf32>
    %c15_i32_25 = arith.constant 15 : i32
    %73 = tpu.dynamic_rotate %61 by %c15_i32_25 dim 1 : vector<8x512xf32>, i32 -> vector<8x512xf32>
    %74 = arith.andi %6, %12 : vector<1x512xi1>
    %cst_26 = arith.constant 0.000000e+00 : f32
    %75 = vector.shape_cast %74 : vector<1x512xi1> to vector<1x512xi1>
    %76 = vector.broadcast %75 : vector<1x512xi1> to vector<8x512xi1>
    %77 = vector.broadcast %cst_26 : f32 to vector<8x512xf32>
    %78 = arith.select %76, %73, %77 : vector<8x512xi1>, vector<8x512xf32>
    %c1_i32_27 = arith.constant 1 : i32
    %79 = tpu.dynamic_rotate %61 by %c1_i32_27 dim 1 : vector<8x512xf32>, i32 -> vector<8x512xf32>
    %cst_28 = arith.constant 0.000000e+00 : f32
    %80 = vector.shape_cast %10 : vector<1x512xi1> to vector<1x512xi1>
    %81 = vector.broadcast %80 : vector<1x512xi1> to vector<8x512xi1>
    %82 = vector.broadcast %cst_28 : f32 to vector<8x512xf32>
    %83 = arith.select %81, %79, %82 : vector<8x512xi1>, vector<8x512xf32>
    %c511_i32_29 = arith.constant 511 : i32
    %84 = tpu.dynamic_rotate %61 by %c511_i32_29 dim 1 : vector<8x512xf32>, i32 -> vector<8x512xf32>
    %cst_30 = arith.constant 0.000000e+00 : f32
    %85 = vector.shape_cast %12 : vector<1x512xi1> to vector<1x512xi1>
    %86 = vector.broadcast %85 : vector<1x512xi1> to vector<8x512xi1>
    %87 = vector.broadcast %cst_30 : f32 to vector<8x512xf32>
    %88 = arith.select %86, %84, %87 : vector<8x512xi1>, vector<8x512xf32>
    %c497_i32_31 = arith.constant 497 : i32
    %89 = tpu.dynamic_rotate %61 by %c497_i32_31 dim 1 : vector<8x512xf32>, i32 -> vector<8x512xf32>
    %90 = arith.andi %8, %10 : vector<1x512xi1>
    %cst_32 = arith.constant 0.000000e+00 : f32
    %91 = vector.shape_cast %90 : vector<1x512xi1> to vector<1x512xi1>
    %92 = vector.broadcast %91 : vector<1x512xi1> to vector<8x512xi1>
    %93 = vector.broadcast %cst_32 : f32 to vector<8x512xf32>
    %94 = arith.select %92, %89, %93 : vector<8x512xi1>, vector<8x512xf32>
    %c496_i32_33 = arith.constant 496 : i32
    %95 = tpu.dynamic_rotate %61 by %c496_i32_33 dim 1 : vector<8x512xf32>, i32 -> vector<8x512xf32>
    %cst_34 = arith.constant 0.000000e+00 : f32
    %96 = vector.shape_cast %8 : vector<1x512xi1> to vector<1x512xi1>
    %97 = vector.broadcast %96 : vector<1x512xi1> to vector<8x512xi1>
    %98 = vector.broadcast %cst_34 : f32 to vector<8x512xf32>
    %99 = arith.select %97, %95, %98 : vector<8x512xi1>, vector<8x512xf32>
    %c495_i32_35 = arith.constant 495 : i32
    %100 = tpu.dynamic_rotate %61 by %c495_i32_35 dim 1 : vector<8x512xf32>, i32 -> vector<8x512xf32>
    %101 = arith.andi %8, %12 : vector<1x512xi1>
    %cst_36 = arith.constant 0.000000e+00 : f32
    %102 = vector.shape_cast %101 : vector<1x512xi1> to vector<1x512xi1>
    %103 = vector.broadcast %102 : vector<1x512xi1> to vector<8x512xi1>
    %104 = vector.broadcast %cst_36 : f32 to vector<8x512xf32>
    %105 = arith.select %103, %100, %104 : vector<8x512xi1>, vector<8x512xf32>
    %106 = tpu.concatenate %67, %72, %78, %83, %61, %88, %94, %99, %105 in 0 : vector<8x512xf32>, vector<8x512xf32>, vector<8x512xf32>, vector<8x512xf32>, vector<8x512xf32>, vector<8x512xf32>, vector<8x512xf32>, vector<8x512xf32>, vector<8x512xf32> -> vector<72x512xf32>
    %cst_37 = arith.constant dense<0.000000e+00> : vector<8x512xf32>
    %107 = tpu.matmul %2, %106, %cst_37 {dimension_numbers = #tpu.dot_dimension_numbers<[1], [0], [0], [1], [0, 0, 1, 1], [], []>} : vector<8x72xf32>, vector<72x512xf32>, vector<8x512xf32> -> vector<8x512xf32>
    %108 = arith.addf %107, %0 : vector<8x512xf32>
    %c0_38 = arith.constant 0 : index
    %c0_39 = arith.constant 0 : index
    %109 = vector.load %arg4[%c0_38, %c0_39] : memref<8x512xf32, #tpu.memory_space<vmem>>, vector<8x512xf32>
    tpu.vector_store %arg4[%c0_38, %c0_39], %108 {strides = array<i32>} : memref<8x512xf32, #tpu.memory_space<vmem>>, vector<8x512xf32>,
    return
  }
}

</mosaic_0001>

<bundles_post_ra>
// kernel: resblock_pallas.1
= control target key start
LH: loop header
LB: loop body
LE: loop exit
PB: predicated region body
PF: predicated region fallthrough
CT: control target
= control target key end

     0   :  { %s1091_s23 = smov 16   ;;  %s1092_s24 = smov 17   ;;  %v1097_v6 = vmov 0.0   ;;  %v38_v9 = vlaneseq  ;;  %v1100_v12 = vmov 0   ;;  %v1917_v27 = vmov 0  ;;  %s1867_s0 = inlined_call_operand.vmem [shape: f32[8,512], index: 0, kind: input, shape index: {}]   ;;  %s1868_s3 = inlined_call_operand.vmem [shape: f32[2,512], index: 3, kind: input, shape index: {}]   ;;  %s1869_s1 = inlined_call_operand.vmem [shape: f32[8,72], index: 1, kind: input, shape index: {}]   ;;  %s1870_s2 = inlined_call_operand.vmem [shape: f32[8,72], index: 2, kind: input, shape index: {}]   ;;  %s1871_s4 = inlined_call_operand.vmem [shape: f32[8,512], index: 4, kind: output, shape index: {}]  }
   0x1   :  { %v1130_v0 = vld [vmem:[%s1867_s0] sm:$0xff]  ;;  %v1135_v1 = vld [vmem:[%s1867_s0 + $0x8] sm:$0xff]  ;;  %v1140_v2 = vld [vmem:[%s1867_s0 + $0x10] sm:$0xff]  ;;  %s1093_s25 = smov 15   ;;  %s1095_s26 = smov 127   ;;  %408 = vmatprep.mubr.f32.mxu0 %v1097_v6  ;;  %479 = vmatprep.mubr.f32.mxu1 %v1097_v6  ;;  %v1919_v28 = vmov 0 }
   0x2   :  { %v961_v3 = vpack.i.bf16 %v1135_v1, %v1130_v0  ;;  %v1147_v4 = vld [vmem:[%s1867_s0 + $0x18] sm:$0xff]  ;;  %s1094_s0 = smov 1   ;;  %s1096_s27 = smov 113   ;;  %v1178_v7 = vld [vmem:[%s1868_s3] ss:$2 sm:$0xf] }
   0x3   :  { %v966_v5 = vpack.i.bf16 %v1147_v4, %v1140_v2  ;;  %s1098_s28 = smov 112   ;;  %s1099_s29 = smov 111   ;;  %v1183_v8 = vld [vmem:[%s1868_s3 + $0x1] ss:$2 sm:$0xf]  ;;  %vm26_vm0 = vcmp.ge.f32.partialorder %v1178_v7, 1.0 }
   0x4   :  { %962 = vrot.lane.b32.xlu1 %v961_v3, %s1091_s23  ;;  %952 = vrot.lane.b32.xlu0 %v961_v3, %s1092_s24  ;;  %vm28_vm1 = vcmp.ge.f32.partialorder %v1183_v8, 1.0  ;;  %v48_v10 = vshrl.u32 %v38_v9, 7  ;;  %vm1872_vm3 = vcmp.le.f32.partialorder %v1183_v8, 14.0  ;;  %v84_v14 = vsel %vm26_vm0, 1, %v1100_v12 }
   0x5   :  { %vm45_vm2 = vmand %vm26_vm0, %vm28_vm1  ;;  %v1202_v17 = vand.u32 127, %v38_v9  ;;  %vm1875_vm5 = vcmp.le.f32.partialorder %v1178_v7, 14.0  ;;  %v161_v26 = vsel %vm28_vm1, 1, %v1100_v12  ;;  %v1921_v30 = vmov 0 }
   0x6   :  { %v1192_v11 = vsub.s32 1, %v48_v10  ;;  %v46_v13 = vsel %vm45_vm2, 1, %v1100_v12  ;;  %v1198_v15 = vsub.s32 0, %v48_v10  ;;  %v1200_v16 = vsub.s32 3, %v48_v10  ;;  %vm122_vm4 = vmand %vm26_vm0, %vm1872_vm3 }
   0x7   :  { %v1206_v20 = vsub.s32 2, %v48_v10  ;;  %vm1874_vm6 = vcmp.lt.s32.totalorder %v1202_v17, 17  ;;  %v123_v25 = vsel %vm122_vm4, 1, %v1100_v12  ;;  %vm1873_vm8 = vcmp.lt.s32.totalorder %v1202_v17, 16  ;;  %vm1291_vm14 = vmand %vm1875_vm5, %vm28_vm1 }
   0x8   :  { %967 = vrot.lane.b32.xlu1 %v966_v5, %s1091_s23  ;;  %957 = vrot.lane.b32.xlu0 %v966_v5, %s1092_s24  ;;  %v54_v18 = vrot.slane %v46_v13, %v1192_v11  ;;  %v92_v19 = vrot.slane %v84_v14, %v1192_v11  ;;  %v50_v21 = vrot.slane %v46_v13, %v1198_v15  ;;  %v1923_v31 = vmov 0 }
   0x9   :  { %v88_v22 = vrot.slane %v84_v14, %v1198_v15  ;;  %v62_v23 = vrot.slane %v46_v13, %v1200_v16  ;;  %v100_v24 = vrot.slane %v84_v14, %v1200_v16  ;;  %v58_v29 = vrot.slane %v46_v13, %v1206_v20 }
   0xa   :  { %vm1222_vm7 = vcmp.eq.s32.totalorder %v54_v18, 1  ;;  %vm1227_vm9 = vcmp.eq.s32.totalorder %v92_v19, 1  ;;  %vm1232_vm10 = vcmp.eq.s32.totalorder %v50_v21, 1  ;;  %v1925_v32 = vmov 0 }
   0xb   :  { %v1918_v27 = vsel %vm1222_vm7, 4294967295, %v1917_v27  ;;  %v1920_v28 = vsel %vm1227_vm9, 4294967295, %v1919_v28  ;;  %v1922_v30 = vsel %vm1232_vm10, 4294967295, %v1921_v30  ;;  %vm1236_vm11 = vcmp.eq.s32.totalorder %v88_v22, 1  ;;  %vm1947_vm5 = vmpackc.low %vm1227_vm9, %vm1222_vm7 }
   0xc   :  { %977 = vrot.lane.b32.xlu1 %v966_v5, %s1093_s25  ;;  %972 = vrot.lane.b32.xlu0 %v961_v3, %s1093_s25  ;;  %v1924_v31 = vsel %vm1236_vm11, 4294967295, %v1923_v31  ;;  %vm1240_vm12 = vcmp.eq.s32.totalorder %v62_v23, 1  ;;  %v96_v33 = vrot.slane %v84_v14, %v1206_v20  ;;  %vm1245_vm13 = vcmp.eq.s32.totalorder %v100_v24, 1 }
   0xd   :  { %v1926_v32 = vsel %vm1240_vm12, 4294967295, %v1925_v32  ;;  %v1927_v34 = vmov 0  ;;  %v131_v35 = vrot.slane %v123_v25, %v1192_v11  ;;  %v169_v36 = vrot.slane %v161_v26, %v1192_v11 }
   0xe   :  { %v1928_v34 = vsel %vm1245_vm13, 4294967295, %v1927_v34  ;;  %v139_v37 = vrot.slane %v123_v25, %v1200_v16  ;;  %v177_v40 = vrot.slane %v161_v26, %v1200_v16  ;;  %v127_v41 = vrot.slane %v123_v25, %v1198_v15 }
   0xf   :  { %v165_v42 = vrot.slane %v161_v26, %v1198_v15  ;;  %v1258_v43 = vsel %vm1872_vm3, 1, %v1100_v12  ;;  %vm1264_vm15 = vcmp.eq.s32.totalorder %v58_v29, 1  ;;  %v1929_v48 = vmov 0 }
  0x10   :  { %987 = vrot.lane.b32.xlu1 %v966_v5, %s1094_s0  ;;  %982 = vrot.lane.b32.xlu0 %v961_v3, %s1094_s0  ;;  %v1930_v48 = vsel %vm1264_vm15, 4294967295, %v1929_v48  ;;  %vm1268_vm0 = vcmp.eq.s32.totalorder %v96_v33, 1  ;;  %v1931_v49 = vmov 0  ;;  %v135_v50 = vrot.slane %v123_v25, %v1206_v20 }
  0x11   :  { %v1932_v49 = vsel %vm1268_vm0, 4294967295, %v1931_v49  ;;  %v173_v51 = vrot.slane %v161_v26, %v1206_v20  ;;  %vm1279_vm4 = vcmp.eq.s32.totalorder %v131_v35, 1  ;;  %v1933_v54 = vmov 0 }
  0x12   :  { %v1934_v54 = vsel %vm1279_vm4, 4294967295, %v1933_v54  ;;  %vm1283_vm3 = vcmp.eq.s32.totalorder %v169_v36, 1  ;;  %v1939_v60 = vmov 0  ;;  %v1941_v61 = vmov 0 }
  0x13   :  { %v207_v62 = vrot.slane %v1258_v43, %v1192_v11  ;;  %vm1306_vm1 = vcmp.eq.s32.totalorder %v127_v41, 1  ;;  %v1943_v10 = vmov 0  ;;  %vm1310_vm2 = vcmp.eq.s32.totalorder %v165_v42, 1 }
  0x14   :  { %997 = vrot.lane.b32.xlu1 %v966_v5, %s1095_s26  ;;  %992 = vrot.lane.b32.xlu0 %v961_v3, %s1095_s26  ;;  %v1944_v10 = vsel %vm1306_vm1, 4294967295, %v1943_v10  ;;  %v1945_v13 = vmov 0  ;;  %v1948_v14 = vmov 0  ;;  %vm1327_vm1 = vcmp.eq.s32.totalorder %v173_v51, 1 }
  0x15   :  { %v1946_v13 = vsel %vm1310_vm2, 4294967295, %v1945_v13  ;;  %v1950_v18 = vmov 0  ;;  %v215_v19 = vrot.slane %v1258_v43, %v1200_v16  ;;  %v203_v21 = vrot.slane %v1258_v43, %v1198_v15 }
  0x16   :  { %v1951_v18 = vsel %vm1327_vm1, 4294967295, %v1950_v18  ;;  %v211_v22 = vrot.slane %v1258_v43, %v1206_v20  ;;  %v1340_v23 = vsel %vm1291_vm14, 1, %v1100_v12  ;;  %vm1883_vm1 = vmpackc.low %vm1245_vm13, %vm1240_vm12  ;;  %v1963_v51 = vmov 0 }
  0x17   :  { %v246_v41 = vrot.slane %v1340_v23, %v1192_v11 }
  0x18   :  { %1007 = vrot.lane.b32.xlu1 %v966_v5, %s1096_s27  ;;  %1002 = vrot.lane.b32.xlu0 %v961_v3, %s1096_s27 }
  0x1c   :  { %1017 = vrot.lane.b32.xlu1 %v966_v5, %s1098_s28  ;;  %1012 = vrot.lane.b32.xlu0 %v961_v3, %s1098_s28 }
  0x20   :  { %303 = vrot.lane.b32.xlu1 %v1135_v1, %s1099_s29  ;;  %301 = vrot.lane.b32.xlu0 %v1130_v0, %s1099_s29 }
  0x24   :  { %307 = vrot.lane.b32.xlu1 %v1147_v4, %s1099_s29  ;;  %305 = vrot.lane.b32.xlu0 %v1140_v2, %s1099_s29 }
  0x76   :  { %v963_v38 = vpop.permute.xlu1 %962  ;;  %v953_v39 = vpop.permute.xlu0 %952 }
  0x77   :  { %v965_v44 = vunpack.i.h.bf16 %v963_v38  ;;  %v964_v45 = vunpack.i.l.bf16 %v963_v38  ;;  %v955_v46 = vunpack.i.h.bf16 %v953_v39  ;;  %v954_v47 = vunpack.i.l.bf16 %v953_v39 }
  0x79   :  { %v43_v52 = vsel %vm1874_vm6, %v954_v47, %v955_v46  ;;  %v82_v53 = vsel %vm1873_vm8, %v964_v45, %v965_v44  ;;  %vm1296_vm8 = vcmp.eq.s32.totalorder %v139_v37, 1  ;;  %vm1300_vm6 = vcmp.eq.s32.totalorder %v177_v40, 1 }
  0x7a   :  { %v968_v57 = vpop.permute.xlu1 %967  ;;  %v958_v58 = vpop.permute.xlu0 %957  ;;  %v844_v59 = vpack.c.bf16 %v82_v53, %v43_v52  ;;  %v1940_v60 = vsel %vm1296_vm8, 4294967295, %v1939_v60  ;;  %v1942_v61 = vsel %vm1300_vm6, 4294967295, %v1941_v61  ;;  %vm1323_vm8 = vcmp.eq.s32.totalorder %v135_v50, 1 }
  0x7b   :  { %v970_v63 = vunpack.i.h.bf16 %v968_v57  ;;  %v969_v3 = vunpack.i.l.bf16 %v968_v57  ;;  %v960_v5 = vunpack.i.h.bf16 %v958_v58  ;;  %v959_v9 = vunpack.i.l.bf16 %v958_v58 }
  0x7c   :  { %846 = vmatprep.subr.msk.bf16.mxu0 %vm1947_vm5, %v844_v59  ;;  %v1949_v14 = vsel %vm1323_vm8, 4294967295, %v1948_v14  ;;  %vm1952_vm5 = vcmp.lt.s32.totalorder %v1202_v17, 17  ;;  %vm1953_vm6 = vcmp.lt.s32.totalorder %v1202_v17, 16  ;;  %v1961_v50 = vmov 0 }
  0x7d   :  { %v44_v24 = vsel %vm1952_vm5, %v960_v5, %v954_v47  ;;  %v83_v25 = vsel %vm1953_vm6, %v970_v63, %v964_v45  ;;  %vm1954_vm7 = vmmov %vm1952_vm5  ;;  %v81_v39 = vsel %vm1953_vm6, %v965_v44, %v969_v3  ;;  %v254_v52 = vrot.slane %v1340_v23, %v1200_v16 }
  0x7e   :  { %v41_v26 = vsel %vm1954_vm7, %v959_v9, %v960_v5  ;;  %vm1955_vm9 = vmmov %vm1953_vm6  ;;  %v978_v33 = vpop.permute.xlu1 %977  ;;  %v973_v35 = vpop.permute.xlu0 %972  ;;  %v847_v36 = vpack.c.bf16 %v83_v25, %v44_v24  ;;  %vm1380_vm6 = vcmp.eq.s32.totalorder %v207_v62, 1  ;;  %vm1388_vm7 = vcmp.eq.s32.totalorder %v203_v21, 1 }
  0x7f   :  { %v80_v29 = vsel %vm1955_vm9, %v969_v3, %v970_v63  ;;  %vm1956_vm14 = vmmov %vm1952_vm5  ;;  %v980_v40 = vunpack.i.h.bf16 %v978_v33  ;;  %vm1957_vm5 = vcmp.le.f32.partialorder %v1178_v7, 14.0  ;;  %v979_v43 = vunpack.i.l.bf16 %v978_v33 }
  0x80   :  { %v868_v37 = vpack.c.bf16 %v80_v29, %v41_v26  ;;  %v42_v38 = vsel %vm1956_vm14, %v955_v46, %v959_v9  ;;  %vm1882_vm9 = vmpackc.low %vm1268_vm0, %vm1264_vm15  ;;  %v1368_v42 = vsel %vm1957_vm5, 1, %v1100_v12  ;;  %v975_v45 = vunpack.i.h.bf16 %v973_v35 }
  0x81   :  { %v974_v46 = vunpack.i.l.bf16 %v973_v35  ;;  %vm1958_vm14 = vmpackc.low %vm1236_vm11, %vm1232_vm10  ;;  %v871_v44 = vpack.c.bf16 %v81_v39, %v42_v38  ;;  %vm1384_vm5 = vcmp.eq.s32.totalorder %v215_v19, 1  ;;  %v1964_v51 = vsel %vm1388_vm7, 4294967295, %v1963_v51 }
  0x82   :  { %849 = vmatpush1.bf16.msk.msra.mxu0 %vm1958_vm14, %v847_v36  ;;  %870 = vmatprep.subr.msk.bf16.mxu1 %vm1883_vm1, %v868_v37  ;;  %v1962_v50 = vsel %vm1384_vm5, 4294967295, %v1961_v50  ;;  %v988_v53 = vpop.permute.xlu1 %987  ;;  %v983_v56 = vpop.permute.xlu0 %982  ;;  %vm1399_vm14 = vcmp.eq.s32.totalorder %v211_v22, 1  ;;  %v1965_v57 = vmov 0  ;;  %v284_v58 = vrot.slane %v1368_v42, %v1192_v11 }
  0x83   :  { %873 = vmatpush1.bf16.msk.msra.mxu1 %vm1882_vm9, %v871_v44  ;;  %v1966_v57 = vsel %vm1399_vm14, 4294967295, %v1965_v57  ;;  %v292_v59 = vrot.slane %v1368_v42, %v1200_v16  ;;  %v242_v62 = vrot.slane %v1340_v23, %v1198_v15  ;;  %v990_v63 = vunpack.i.h.bf16 %v988_v53 }
  0x84   :  { %v989_v3 = vunpack.i.l.bf16 %v988_v53  ;;  %v985_v5 = vunpack.i.h.bf16 %v983_v56  ;;  %v984_v9 = vunpack.i.l.bf16 %v983_v56  ;;  %vm1967_vm1 = vcmp.lt.s32.totalorder %v1202_v17, 15 }
  0x85   :  { %v118_v19 = vsel %vm1967_vm1, %v979_v43, %v980_v40  ;;  %vm1968_vm15 = vmmov %vm1967_vm1  ;;  %vm1971_vm11 = vnez %v1940_v60  ;;  %vm1972_vm12 = vnez %v1942_v61  ;;  %vm1973_vm14 = vcmp.lt.s32.totalorder %v1202_v17, 1 }
  0x86   :  { %v119_v21 = vsel %vm1968_vm15, %v975_v45, %v979_v43  ;;  %vm1969_vm0 = vmmov %vm1967_vm1  ;;  %v157_v25 = vsel %vm1973_vm14, %v989_v3, %v990_v63  ;;  %vm1978_vm7 = vcmp.le.f32.partialorder %v1178_v7, 14.0  ;;  %v993_v43 = vpop.permute.xlu0 %992  ;;  %v1984_v44 = vmov 0 }
  0x87   :  { %v120_v22 = vsel %vm1969_vm0, %v974_v46, %v975_v45  ;;  %vm1970_vm10 = vmmov %vm1969_vm0  ;;  %v874_v36 = vpack.c.bf16 %v157_v25, %v118_v19  ;;  %v995_v7 = vunpack.i.h.bf16 %v993_v43  ;;  %v280_v53 = vrot.slane %v1368_v42, %v1198_v15 }
  0x88   :  { %v121_v24 = vsel %vm1970_vm10, %v980_v40, %v974_v46  ;;  %vm1890_vm13 = vmpackc.low %vm1972_vm12, %vm1971_vm11  ;;  %vm1977_vm10 = vcmp.le.f32.partialorder %v1183_v8, 14.0  ;;  %v998_v40 = vpop.permute.xlu1 %997  ;;  %v994_v46 = vunpack.i.l.bf16 %v993_v43  ;;  %v250_v56 = vrot.slane %v1340_v23, %v1206_v20 }
  0x89   :  { %vm1974_vm9 = vmmov %vm1973_vm14  ;;  %v1000_v8 = vunpack.i.h.bf16 %v998_v40  ;;  %v999_v45 = vunpack.i.l.bf16 %v998_v40  ;;  %876 = vmatprep.subr.msk.bf16.mxu1 %vm1890_vm13, %v874_v36  ;;  %v2004_v35 = vmov 0 }
  0x8a   :  { %v158_v26 = vsel %vm1974_vm9, %v985_v5, %v989_v3  ;;  %vm1975_vm1 = vmmov %vm1974_vm9  ;;  %vm1981_vm9 = vnez %v1944_v10 }
  0x8b   :  { %v159_v29 = vsel %vm1975_vm1, %v984_v9, %v985_v5  ;;  %vm1976_vm15 = vmmov %vm1975_vm1  ;;  %v877_v39 = vpack.c.bf16 %v158_v26, %v119_v21  ;;  %vm1101_vm1 = vmmov 1   ;;  %v1995_v26 = vmov 0 }
  0x8c   :  { %v160_v33 = vsel %vm1976_vm15, %v990_v63, %v984_v9  ;;  %vm1438_vm5 = vmand %vm1978_vm7, %vm1977_vm10  ;;  %v850_v37 = vpack.c.bf16 %v159_v29, %v120_v22  ;;  %vm1982_vm7 = vnez %v1951_v18  ;;  %v288_v63 = vrot.slane %v1368_v42, %v1206_v20  ;;  %v1008_v25 = vpop.permute.xlu1 %1007 }
  0x8d   :  { %v853_v38 = vpack.c.bf16 %v160_v33, %v121_v24  ;;  %vm1892_vm14 = vmpackc.low %vm1310_vm2, %vm1981_vm9  ;;  %v1477_v3 = vsel %vm1438_vm5, 1, %v1100_v12  ;;  %vm1990_vm5 = vnez %v1962_v50  ;;  %v1991_v12 = vmov 0  ;;  %v1003_v50 = vpop.permute.xlu0 %1002 }
  0x8e   :  { %vm1983_vm10 = vmpackc.low %vm1283_vm3, %vm1279_vm4  ;;  %v1998_v29 = vmov 0  ;;  %v1010_v36 = vunpack.i.h.bf16 %v1008_v25  ;;  %v331_v43 = vrot.slane %v1477_v3, %v1200_v16  ;;  %vm2020_vm4 = vcmp.lt.s32.totalorder %v1202_v17, 112 }
  0x8f   :  { %852 = vmatprep.subr.msk.bf16.mxu0 %vm1983_vm10, %v850_v37  ;;  %vm1464_vm0 = vmpackc.low %vm1380_vm6, %vm1101_vm1  ;;  %vm1986_vm10 = vcmp.lt.s32.totalorder %v1202_v17, 127  ;;  %v1009_v37 = vunpack.i.l.bf16 %v1008_v25  ;;  %v2025_v25 = vmov 0 }
  0x90   :  { %v1985_v44 = vsel %vm1464_vm0, 4294967295, %v1984_v44  ;;  %v195_v47 = vsel %vm1986_vm10, %v999_v45, %v1000_v8  ;;  %vm1987_vm6 = vmmov %vm1986_vm10  ;;  %855 = vmatpush1.bf16.msk.msra.mxu0 %vm1892_vm14, %v853_v38  ;;  %vm1529_vm14 = vcmp.eq.s32.totalorder %v284_v58, 1  ;;  %v1005_v38 = vunpack.i.h.bf16 %v1003_v50  ;;  %v1018_v40 = vpop.permute.xlu1 %1017 }
  0x91   :  { %v196_v5 = vsel %vm1987_vm6, %v995_v7, %v999_v45  ;;  %vm1988_vm13 = vmmov %vm1987_vm6  ;;  %v883_v42 = vpack.c.bf16 %v195_v47, %v1140_v2  ;;  %v2012_v58 = vmov 0  ;;  %v1013_v23 = vpop.permute.xlu0 %1012  ;;  %v327_v45 = vrot.slane %v1477_v3, %v1206_v20 }
  0x92   :  { %v197_v9 = vsel %vm1988_vm13, %v994_v46, %v995_v7  ;;  %vm1989_vm15 = vmmov %vm1987_vm6  ;;  %v856_v21 = vpack.c.bf16 %v196_v5, %v1135_v1  ;;  %vm1997_vm6 = vnez %v1966_v57  ;;  %v1020_v7 = vunpack.i.h.bf16 %v1018_v40 }
  0x93   :  { %v198_v19 = vsel %vm1989_vm15, %v1000_v8, %v994_v46  ;;  %vm1495_vm11 = vmpackc.low %vm1990_vm5, %vm1101_vm1  ;;  %v859_v22 = vpack.c.bf16 %v197_v9, %v1130_v0  ;;  %vm1994_vm15 = vnez %v1964_v51  ;;  %v319_v8 = vrot.slane %v1477_v3, %v1198_v15 }
  0x94   :  { %v1992_v12 = vsel %vm1495_vm11, 4294967295, %v1991_v12  ;;  %v880_v24 = vpack.c.bf16 %v198_v19, %v1147_v4  ;;  %vm1993_vm13 = vmpackc.low %vm1982_vm7, %vm1323_vm8  ;;  %vm1537_vm8 = vcmp.eq.s32.totalorder %v292_v59, 1  ;;  %858 = vmatprep.subr.msk.bf16.mxu0 %vm1464_vm0, %v856_v21  ;;  %vm1558_vm7 = vcmp.eq.s32.totalorder %v250_v56, 1 }
  0x95   :  { %879 = vmatpush1.bf16.msk.msra.mxu1 %vm1993_vm13, %v877_v39  ;;  %vm1511_vm10 = vmpackc.low %vm1994_vm15, %vm1101_vm1  ;;  %vm1525_vm13 = vcmp.eq.s32.totalorder %v246_v41, 1  ;;  %vm1533_vm15 = vcmp.eq.s32.totalorder %v254_v52, 1  ;;  %v1004_v39 = vunpack.i.l.bf16 %v1003_v50  ;;  %v2008_v41 = vmov 0 }
  0x96   :  { %v1996_v26 = vsel %vm1511_vm10, 4294967295, %v1995_v26  ;;  %vm1518_vm5 = vmpackc.low %vm1997_vm6, %vm1101_vm1  ;;  %v2005_v35 = vsel %vm1533_vm15, 4294967295, %v2004_v35  ;;  %882 = vmatprep.subr.msk.bf16.mxu1 %vm1495_vm11, %v880_v24  ;;  %861 = vmatpush1.bf16.msk.msra.mxu0 %vm1511_vm10, %v859_v22  ;;  %vm1550_vm1 = vcmp.eq.s32.totalorder %v242_v62, 1  ;;  %vm1554_vm6 = vcmp.eq.s32.totalorder %v280_v53, 1  ;;  %v304_v22 = vpop.permute.xlu1 %303  ;;  %v302_v24 = vpop.permute.xlu0 %301 }
  0x97   :  { %v1999_v29 = vsel %vm1518_vm5, 4294967295, %v1998_v29  ;;  %v2009_v41 = vsel %vm1550_vm1, 4294967295, %v2008_v41  ;;  %v2010_v52 = vmov 0  ;;  %v2013_v58 = vsel %vm1558_vm7, 4294967295, %v2012_v58  ;;  %vm1907_vm12 = vmpackc.low %vm1537_vm8, %vm1533_vm15 }
  0x98   :  { %v2011_v52 = vsel %vm1554_vm6, 4294967295, %v2010_v52  ;;  %v323_v59 = vrot.slane %v1477_v3, %v1192_v11  ;;  %vm1566_vm10 = vcmp.eq.s32.totalorder %v288_v63, 1  ;;  %v2014_v62 = vmov 0 }
  0x99   :  { %885 = vmatpush1.bf16.msk.msra.mxu1 %vm1518_vm5, %v883_v42  ;;  %v2015_v62 = vsel %vm1566_vm10, 4294967295, %v2014_v62  ;;  %v1019_v11 = vunpack.i.l.bf16 %v1018_v40  ;;  %v1015_v46 = vunpack.i.h.bf16 %v1013_v23  ;;  %v1014_v53 = vunpack.i.l.bf16 %v1013_v23  ;;  %vm2021_vm5 = vmmov %vm2020_vm4 }
  0x9a   :  { %vm2016_vm11 = vcmp.lt.s32.totalorder %v1202_v17, 113  ;;  %v2027_v50 = vmov 0 }
  0x9b   :  { %v233_v56 = vsel %vm2016_vm11, %v1009_v37, %v1010_v36  ;;  %vm2017_vm0 = vmmov %vm2016_vm11  ;;  %v272_v63 = vsel %vm2020_vm4, %v1019_v11, %v1020_v7  ;;  %v273_v3 = vsel %vm2021_vm5, %v1015_v46, %v1019_v11  ;;  %vm1906_vm5 = vcmp.lt.s32.totalorder %v1202_v17, 111 }
  0x9c   :  { %v234_v16 = vsel %vm2017_vm0, %v1005_v38, %v1009_v37  ;;  %vm2018_vm9 = vmmov %vm2017_vm0  ;;  %v889_v9 = vpack.c.bf16 %v272_v63, %v233_v56  ;;  %v306_v37 = vpop.permute.xlu0 %305 }
  0x9d   :  { %v235_v15 = vsel %vm2018_vm9, %v1004_v39, %v1005_v38  ;;  %vm2019_vm2 = vmmov %vm2017_vm0  ;;  %v862_v19 = vpack.c.bf16 %v273_v3, %v234_v16  ;;  %v2029_v38 = vmov 0  ;;  %v311_v23 = vsel %vm1906_vm5, %v304_v22, %v306_v37 }
  0x9e   :  { %v236_v20 = vsel %vm2019_vm2, %v1010_v36, %v1004_v39  ;;  %vm2022_vm11 = vmmov %vm2020_vm4  ;;  %v308_v36 = vpop.permute.xlu1 %307  ;;  %v2031_v39 = vmov 0 }
  0x9f   :  { %v274_v47 = vsel %vm2022_vm11, %v1014_v53, %v1015_v46  ;;  %vm2023_vm0 = vmmov %vm2020_vm4  ;;  %vm1629_vm11 = vcmp.eq.s32.totalorder %v323_v59, 1  ;;  %v313_v59 = vsel %vm1906_vm5, %v308_v36, %v302_v24  ;;  %v310_v40 = vsel %vm1906_vm5, %v306_v37, %v308_v36 }
  0xa0   :  { %v275_v5 = vsel %vm2023_vm0, %v1020_v7, %v1014_v53  ;;  %vm1903_vm2 = vmpackc.low %vm1554_vm6, %vm1550_vm1  ;;  %v865_v42 = vpack.c.bf16 %v274_v47, %v235_v15  ;;  %v2026_v25 = vsel %vm1629_vm11, 4294967295, %v2025_v25  ;;  %vm1633_vm0 = vcmp.eq.s32.totalorder %v331_v43, 1  ;;  %v21_v43 = vld [vmem:[%s1869_s1] sm:$0xff] }
  0xa1   :  { %v886_v21 = vpack.c.bf16 %v275_v5, %v236_v20  ;;  %vm1904_vm4 = vmpackc.low %vm1566_vm10, %vm1558_vm7  ;;  %v2028_v50 = vsel %vm1633_vm0, 4294967295, %v2027_v50  ;;  %vm2048_vm7 = vnez %v1922_v30  ;;  %vm2050_vm1 = vnez %v1932_v49 }
  0xa2   :  { %vm2024_vm9 = vmpackc.low %vm1529_vm14, %vm1525_vm13  ;;  %vm2051_vm6 = vnez %v1930_v48 }
  0xa3   :  { %864 = vmatprep.subr.msk.bf16.mxu0 %vm2024_vm9, %v862_v19  ;;  %888 = vmatprep.subr.msk.bf16.mxu1 %vm1907_vm12, %v886_v21  ;;  %vm1637_vm9 = vcmp.eq.s32.totalorder %v319_v8, 1  ;;  %v312_v8 = vsel %vm1906_vm5, %v302_v24, %v304_v22  ;;  %vm2052_vm15 = vmpackc.low %vm2050_vm1, %vm2051_vm6 }
  0xa4   :  { %867 = vmatpush1.bf16.msk.msra.mxu0 %vm1903_vm2, %v865_v42  ;;  %891 = vmatpush1.bf16.msk.msra.mxu1 %vm1904_vm4, %v889_v9  ;;  %v2030_v38 = vsel %vm1637_vm9, 4294967295, %v2029_v38  ;;  %vm1641_vm2 = vcmp.eq.s32.totalorder %v327_v45, 1  ;;  %vm1905_vm4 = vcmask 588800  }
  0xa5   :  { %v2032_v39 = vsel %vm1641_vm2, 4294967295, %v2031_v39  ;;  %790 = vmatprep.subr.msk.mxu0 %vm1629_vm11, %v311_v23  ;;  %807 = vmatprep.subr.msk.mxu1 %vm1633_vm0, %v313_v59 }
  0xa8   :  { %791 = vmatpush1.msk.msra.mxu0 %vm1637_vm9, %v312_v8  ;;  %808 = vmatpush1.msk.msra.mxu1 %vm1641_vm2, %v310_v40  ;;  %vm2037_vm9 = vcmp.lt.s32.totalorder %v1202_v17, 16 }
  0xa9   :  { %792 = vmatmul.mubr.msk.f32.vlgmr.msra.gmra.mrb[0].mxu0 %vm1905_vm4, %v21_v43  ;;  %809 = vmatmul.mubr.msk.f32.vlgmr.msra.gmra.mrb[0].mxu1 %vm1905_vm4, %v21_v43  ;;  %vm2033_vm4 = vcmp.lt.s32.totalorder %v1202_v17, 17  ;;  %vm2038_vm0 = vmmov %vm2037_vm9 }
  0xaa   :  { %689 = vmatprep.mubr.f32.mxu0 %v1097_v6  ;;  %760 = vmatprep.mubr.f32.mxu1 %v1097_v6  ;;  %vm2034_vm5 = vmmov %vm2033_vm4 }
  0xab   :  { %vm2035_vm12 = vmmov %vm2033_vm4 }
  0xac   :  { %vm2036_vm2 = vmmov %vm2033_vm4 }
  0xad   :  { %vm2039_vm11 = vmmov %vm2038_vm0 }
 0x17c   :  { %v410_v45 = vpop.f32.mrb[0].mxu0  ;;  %v481_v7 = vpop.f32.mrb[0].mxu1 }
 0x17d   :  { %v486_v11 = vmul.f32 0.2, %v410_v45  ;;  %v488_v46 = vmul.f32 0.2, %v481_v7  ;;  %v412_v53 = vpop.f32.mrb[1].mxu0  ;;  %v483_v56 = vpop.f32.mrb[1].mxu1 }
 0x17e   :  { %v487_v16 = vmul.f32 0.2, %v412_v53  ;;  %v489_v15 = vmul.f32 0.2, %v483_v56 }
 0x17f   :  { %v1668_v20 = vmax.f32 %v410_v45, %v486_v11  ;;  %v1670_v63 = vmax.f32 %v481_v7, %v488_v46 }
 0x180   :  { %v1672_v3 = vmax.f32 %v412_v53, %v487_v16  ;;  %v1674_v47 = vmax.f32 %v483_v56, %v489_v15 }
 0x182   :  { %v1026_v5 = vpack.i.bf16 %v1674_v47, %v1670_v63  ;;  %v1021_v6 = vpack.i.bf16 %v1672_v3, %v1668_v20 }
 0x184   :  { %1027 = vrot.lane.b32.xlu1 %v1026_v5, %s1092_s24  ;;  %1022 = vrot.lane.b32.xlu0 %v1021_v6, %s1092_s24 }
 0x188   :  { %1037 = vrot.lane.b32.xlu1 %v1026_v5, %s1091_s23  ;;  %1032 = vrot.lane.b32.xlu0 %v1021_v6, %s1091_s23 }
 0x18c   :  { %1047 = vrot.lane.b32.xlu1 %v1026_v5, %s1093_s25  ;;  %1042 = vrot.lane.b32.xlu0 %v1021_v6, %s1093_s25 }
 0x190   :  { %1057 = vrot.lane.b32.xlu1 %v1026_v5, %s1094_s0  ;;  %1052 = vrot.lane.b32.xlu0 %v1021_v6, %s1094_s0 }
 0x194   :  { %1067 = vrot.lane.b32.xlu1 %v1026_v5, %s1095_s26  ;;  %1062 = vrot.lane.b32.xlu0 %v1021_v6, %s1095_s26 }
 0x198   :  { %1077 = vrot.lane.b32.xlu1 %v1026_v5, %s1096_s27  ;;  %1072 = vrot.lane.b32.xlu0 %v1021_v6, %s1096_s27 }
 0x19c   :  { %1087 = vrot.lane.b32.xlu1 %v1026_v5, %s1098_s28  ;;  %1082 = vrot.lane.b32.xlu0 %v1021_v6, %s1098_s28 }
 0x1a0   :  { %608 = vrot.lane.b32.xlu1 %v1672_v3, %s1099_s29  ;;  %606 = vrot.lane.b32.xlu0 %v1668_v20, %s1099_s29 }
 0x1a4   :  { %612 = vrot.lane.b32.xlu1 %v1674_v47, %s1099_s29  ;;  %610 = vrot.lane.b32.xlu0 %v1670_v63, %s1099_s29 }
 0x1f6   :  { %v1028_v9 = vpop.permute.xlu1 %1027  ;;  %v1023_v19 = vpop.permute.xlu0 %1022 }
 0x1f7   :  { %v1030_v42 = vunpack.i.h.bf16 %v1028_v9  ;;  %v1029_v21 = vunpack.i.l.bf16 %v1028_v9  ;;  %v1025_v22 = vunpack.i.h.bf16 %v1023_v19  ;;  %v1024_v24 = vunpack.i.l.bf16 %v1023_v19 }
 0x1f9   :  { %v502_v8 = vsel %vm2033_vm4, %v1029_v21, %v1030_v42  ;;  %v503_v45 = vsel %vm2034_vm5, %v1025_v22, %v1029_v21  ;;  %v504_v7 = vsel %vm2035_vm12, %v1024_v24, %v1025_v22  ;;  %v505_v11 = vsel %vm2036_vm2, %v1030_v42, %v1024_v24  ;;  %vm2040_vm4 = vmmov %vm2038_vm0 }
 0x1fa   :  { %v1038_v36 = vpop.permute.xlu1 %1037  ;;  %v1033_v37 = vpop.permute.xlu0 %1032  ;;  %vm2041_vm12 = vnez %v1920_v28  ;;  %vm2042_vm2 = vnez %v1918_v27 }
 0x1fb   :  { %v1040_v59 = vunpack.i.h.bf16 %v1038_v36  ;;  %v1039_v40 = vunpack.i.l.bf16 %v1038_v36  ;;  %v1035_v23 = vunpack.i.h.bf16 %v1033_v37  ;;  %v1034_v43 = vunpack.i.l.bf16 %v1033_v37  ;;  %vm2043_vm5 = vmpackc.low %vm2041_vm12, %vm2042_vm2 }
 0x1fc   :  { %vm2053_vm12 = vcmp.lt.s32.totalorder %v1202_v17, 15 }
 0x1fd   :  { %v518_v46 = vsel %vm2037_vm9, %v1039_v40, %v1040_v59  ;;  %v519_v53 = vsel %vm2038_vm0, %v1035_v23, %v1039_v40  ;;  %v520_v56 = vsel %vm2039_vm11, %v1034_v43, %v1035_v23  ;;  %v521_v16 = vsel %vm2040_vm4, %v1040_v59, %v1034_v43  ;;  %vm2054_vm2 = vmmov %vm2053_vm12 }
 0x1fe   :  { %v916_v15 = vpack.c.bf16 %v518_v46, %v502_v8  ;;  %v892_v5 = vpack.c.bf16 %v520_v56, %v504_v7  ;;  %v895_v6 = vpack.c.bf16 %v521_v16, %v505_v11  ;;  %v919_v9 = vpack.c.bf16 %v519_v53, %v503_v45  ;;  %v1048_v19 = vpop.permute.xlu1 %1047  ;;  %v1043_v21 = vpop.permute.xlu0 %1042 }
 0x1ff   :  { %v1050_v22 = vunpack.i.h.bf16 %v1048_v19  ;;  %v1049_v42 = vunpack.i.l.bf16 %v1048_v19  ;;  %v1045_v24 = vunpack.i.h.bf16 %v1043_v21  ;;  %v1044_v36 = vunpack.i.l.bf16 %v1043_v21 }
 0x200   :  { %894 = vmatprep.subr.msk.bf16.mxu0 %vm2043_vm5, %v892_v5  ;;  %vm2044_vm11 = vnez %v1928_v34  ;;  %vm2045_vm0 = vnez %v1926_v32  ;;  %vm2047_vm4 = vnez %v1924_v31 }
 0x201   :  { %vm2046_vm9 = vmpackc.low %vm2044_vm11, %vm2045_vm0  ;;  %v534_v40 = vsel %vm2053_vm12, %v1049_v42, %v1050_v22  ;;  %v535_v30 = vsel %vm2054_vm2, %v1045_v24, %v1049_v42  ;;  %vm2061_vm11 = vnez %v1934_v54 }
 0x202   :  { %918 = vmatprep.subr.msk.bf16.mxu1 %vm2046_vm9, %v916_v15  ;;  %vm2049_vm10 = vmpackc.low %vm2047_vm4, %vm2048_vm7  ;;  %v1058_v27 = vpop.permute.xlu1 %1057  ;;  %v1053_v28 = vpop.permute.xlu0 %1052  ;;  %vm2063_vm9 = vnez %v1942_v61  ;;  %vm2064_vm4 = vnez %v1940_v60 }
 0x203   :  { %897 = vmatpush1.bf16.msk.msra.mxu0 %vm2049_vm10, %v895_v6  ;;  %921 = vmatpush1.bf16.msk.msra.mxu1 %vm2052_vm15, %v919_v9  ;;  %v1060_v37 = vunpack.i.h.bf16 %v1058_v27  ;;  %v1059_v34 = vunpack.i.l.bf16 %v1058_v27  ;;  %v1055_v59 = vunpack.i.h.bf16 %v1053_v28  ;;  %v1054_v32 = vunpack.i.l.bf16 %v1053_v28  ;;  %vm2055_vm7 = vmmov %vm2054_vm2 }
 0x204   :  { %v536_v31 = vsel %vm2055_vm7, %v1044_v36, %v1045_v24  ;;  %vm2056_vm10 = vmmov %vm2054_vm2  ;;  %vm2057_vm15 = vcmp.lt.s32.totalorder %v1202_v17, 1  ;;  %vm2066_vm2 = vcmp.lt.s32.totalorder %v1202_v17, 127 }
 0x205   :  { %v537_v48 = vsel %vm2056_vm10, %v1050_v22, %v1044_v36  ;;  %v550_v49 = vsel %vm2057_vm15, %v1059_v34, %v1060_v37  ;;  %vm2058_vm1 = vmmov %vm2057_vm15 }
 0x206   :  { %v551_v23 = vsel %vm2058_vm1, %v1055_v59, %v1059_v34  ;;  %vm2059_vm6 = vmmov %vm2058_vm1  ;;  %v922_v45 = vpack.c.bf16 %v550_v49, %v534_v40  ;;  %v1068_v53 = vpop.permute.xlu1 %1067  ;;  %v1063_v56 = vpop.permute.xlu0 %1062 }
 0x207   :  { %v552_v43 = vsel %vm2059_vm6, %v1054_v32, %v1055_v59  ;;  %vm2060_vm5 = vmmov %vm2058_vm1  ;;  %v925_v46 = vpack.c.bf16 %v551_v23, %v535_v30  ;;  %v1070_v16 = vunpack.i.h.bf16 %v1068_v53  ;;  %v1069_v15 = vunpack.i.l.bf16 %v1068_v53 }
 0x208   :  { %v553_v8 = vsel %vm2060_vm5, %v1060_v37, %v1054_v32  ;;  %v898_v7 = vpack.c.bf16 %v552_v43, %v536_v31  ;;  %v1065_v5 = vunpack.i.h.bf16 %v1063_v56  ;;  %v1064_v6 = vunpack.i.l.bf16 %v1063_v56  ;;  %vm2062_vm0 = vmpackc.low %vm1283_vm3, %vm2061_vm11 }
 0x209   :  { %v901_v11 = vpack.c.bf16 %v553_v8, %v537_v48  ;;  %vm2065_vm12 = vmpackc.low %vm2063_vm9, %vm2064_vm4  ;;  %v566_v9 = vsel %vm2066_vm2, %v1069_v15, %v1070_v16  ;;  %vm2070_vm3 = vnez %v1946_v13  ;;  %vm2071_vm1 = vnez %v1944_v10 }
 0x20a   :  { %900 = vmatprep.subr.msk.bf16.mxu0 %vm2062_vm0, %v898_v7  ;;  %924 = vmatprep.subr.msk.bf16.mxu1 %vm2065_vm12, %v922_v45  ;;  %vm2067_vm7 = vmmov %vm2066_vm2  ;;  %v931_v55 = vpack.c.bf16 %v566_v9, %v1670_v63  ;;  %vm2073_vm5 = vnez %v1951_v18  ;;  %vm2074_vm11 = vnez %v1949_v14  ;;  %v1078_v42 = vpop.permute.xlu1 %1077  ;;  %v1073_v13 = vpop.permute.xlu0 %1072  ;;  %vm2076_vm9 = vnez %v1985_v44 }
 0x20b   :  { %v567_v19 = vsel %vm2067_vm7, %v1065_v5, %v1069_v15  ;;  %vm2068_vm10 = vmmov %vm2066_vm2  ;;  %v1080_v24 = vunpack.i.h.bf16 %v1078_v42  ;;  %v1079_v10 = vunpack.i.l.bf16 %v1078_v42  ;;  %v1075_v36 = vunpack.i.h.bf16 %v1073_v13 }
 0x20c   :  { %v568_v21 = vsel %vm2068_vm10, %v1064_v6, %v1065_v5  ;;  %vm2069_vm15 = vmmov %vm2066_vm2  ;;  %v904_v60 = vpack.c.bf16 %v567_v19, %v1672_v3  ;;  %v1074_v27 = vunpack.i.l.bf16 %v1073_v13  ;;  %vm2077_vm4 = vnez %v1992_v12 }
 0x20d   :  { %v569_v54 = vsel %vm2069_vm15, %v1070_v16, %v1064_v6  ;;  %vm2072_vm6 = vmpackc.low %vm2070_vm3, %vm2071_vm1  ;;  %v907_v61 = vpack.c.bf16 %v568_v21, %v1668_v20  ;;  %vm2078_vm12 = vnez %v1996_v26  ;;  %vm2079_vm2 = vnez %v1999_v29 }
 0x20e   :  { %903 = vmatpush1.bf16.msk.msra.mxu0 %vm2072_vm6, %v901_v11  ;;  %v928_v22 = vpack.c.bf16 %v569_v54, %v1674_v47  ;;  %vm2075_vm0 = vmpackc.low %vm2073_vm5, %vm2074_vm11  ;;  %v1088_v14 = vpop.permute.xlu1 %1087  ;;  %v1083_v18 = vpop.permute.xlu0 %1082  ;;  %vm2080_vm7 = vcmp.lt.s32.totalorder %v1202_v17, 113  ;;  %vm2084_vm1 = vcmp.lt.s32.totalorder %v1202_v17, 112 }
 0x20f   :  { %927 = vmatpush1.bf16.msk.msra.mxu1 %vm2075_vm0, %v925_v46  ;;  %906 = vmatprep.subr.msk.bf16.mxu0 %vm2076_vm9, %v904_v60  ;;  %v1090_v20 = vunpack.i.h.bf16 %v1088_v14  ;;  %v1089_v63 = vunpack.i.l.bf16 %v1088_v14  ;;  %v1085_v3 = vunpack.i.h.bf16 %v1083_v18  ;;  %v1084_v47 = vunpack.i.l.bf16 %v1083_v18  ;;  %vm2081_vm10 = vmmov %vm2080_vm7 }
 0x210   :  { %930 = vmatprep.subr.msk.bf16.mxu1 %vm2077_vm4, %v928_v22  ;;  %v582_v28 = vsel %vm2080_vm7, %v1079_v10, %v1080_v24  ;;  %v583_v44 = vsel %vm2081_vm10, %v1075_v36, %v1079_v10  ;;  %vm2082_vm15 = vmmov %vm2080_vm7  ;;  %vm2089_vm9 = vnez %v2005_v35  ;;  %vm2094_vm10 = vnez %v2015_v62 }
 0x211   :  { %v584_v12 = vsel %vm2082_vm15, %v1074_v27, %v1075_v36  ;;  %vm2083_vm3 = vmmov %vm2080_vm7  ;;  %v598_v29 = vsel %vm2084_vm1, %v1089_v63, %v1090_v20  ;;  %vm2095_vm15 = vnez %v2013_v58 }
 0x212   :  { %909 = vmatpush1.bf16.msk.msra.mxu0 %vm2078_vm12, %v907_v61  ;;  %v585_v26 = vsel %vm2083_vm3, %v1080_v24, %v1074_v27  ;;  %vm2085_vm6 = vmmov %vm2084_vm1  ;;  %v937_v32 = vpack.c.bf16 %v598_v29, %v582_v28  ;;  %v609_v48 = vpop.permute.xlu1 %608  ;;  %v607_v49 = vpop.permute.xlu0 %606  ;;  %vm2091_vm12 = vnez %v2011_v52 }
 0x213   :  { %933 = vmatpush1.bf16.msk.msra.mxu1 %vm2079_vm2, %v931_v55  ;;  %v599_v37 = vsel %vm2085_vm6, %v1085_v3, %v1089_v63  ;;  %vm2086_vm5 = vmmov %vm2084_vm1  ;;  %vm2092_vm2 = vnez %v2009_v41  ;;  %v22_v41 = vld [vmem:[%s1870_s2] sm:$0xff]  ;;  %vm2101_vm6 = vnez %v2026_v25 }
 0x214   :  { %v600_v34 = vsel %vm2086_vm5, %v1084_v47, %v1085_v3  ;;  %vm2087_vm11 = vmmov %vm2084_vm1  ;;  %v910_v40 = vpack.c.bf16 %v599_v37, %v583_v44  ;;  %vm2102_vm5 = vnez %v2028_v50 }
 0x215   :  { %v601_v59 = vsel %vm2087_vm11, %v1090_v20, %v1084_v47  ;;  %v913_v30 = vpack.c.bf16 %v600_v34, %v584_v12  ;;  %vm2088_vm0 = vmpackc.low %vm1529_vm14, %vm1525_vm13  ;;  %vm2097_vm14 = vcmp.lt.s32.totalorder %v1202_v17, 111  ;;  %vm2103_vm11 = vnez %v2030_v38 }
 0x216   :  { %v934_v31 = vpack.c.bf16 %v601_v59, %v585_v26  ;;  %912 = vmatprep.subr.msk.bf16.mxu0 %vm2088_vm0, %v910_v40  ;;  %vm2090_vm4 = vmpackc.low %vm1537_vm8, %vm2089_vm9  ;;  %v613_v33 = vpop.permute.xlu1 %612  ;;  %v611_v51 = vpop.permute.xlu0 %610  ;;  %vm2104_vm0 = vnez %v2032_v39  ;;  %vm2105_vm9 = vcmask 588800  }
 0x217   :  { %vm2093_vm7 = vmpackc.low %vm2091_vm12, %vm2092_vm2  ;;  %v617_v57 = vsel %vm2097_vm14, %v613_v33, %v607_v49 }
 0x218   :  { %936 = vmatprep.subr.msk.bf16.mxu1 %vm2090_vm4, %v934_v31  ;;  %915 = vmatpush1.bf16.msk.msra.mxu0 %vm2093_vm7, %v913_v30  ;;  %vm2096_vm3 = vmpackc.low %vm2094_vm10, %vm2095_vm15 }
 0x219   :  { %939 = vmatpush1.bf16.msk.msra.mxu1 %vm2096_vm3, %v937_v32  ;;  %vm2098_vm8 = vmmov %vm2097_vm14 }
 0x21a   :  { %v614_v35 = vsel %vm2098_vm8, %v611_v51, %v613_v33  ;;  %vm2099_vm13 = vmmov %vm2098_vm8  ;;  %841 = vmatprep.subr.msk.mxu1 %vm2102_vm5, %v617_v57 }
 0x21b   :  { %v615_v52 = vsel %vm2099_vm13, %v609_v48, %v611_v51  ;;  %vm2100_vm1 = vmmov %vm2098_vm8 }
 0x21c   :  { %v616_v58 = vsel %vm2100_vm1, %v607_v49, %v609_v48  ;;  %824 = vmatprep.subr.msk.mxu0 %vm2101_vm6, %v615_v52  ;;  %vm2106_vm4 = vmmov %vm2105_vm9 }
 0x21d   :  { %825 = vmatpush1.msk.msra.mxu0 %vm2103_vm11, %v616_v58  ;;  %842 = vmatpush1.msk.msra.mxu1 %vm2104_vm0, %v614_v35 }
 0x21e   :  { %826 = vmatmul.mubr.msk.f32.vlgmr.msra.gmra.mrb[2].mxu0 %vm2105_vm9, %v22_v41  ;;  %843 = vmatmul.mubr.msk.f32.vlgmr.msra.gmra.mrb[2].mxu1 %vm2106_vm4, %v22_v41 }
 0x2f1   :  { %v691_v62 = vpop.f32.mrb[2].mxu0  ;;  %v762_v23 = vpop.f32.mrb[2].mxu1 }
 0x2f2   :  { %v692_v17 = vadd.f32 %v691_v62, %v1130_v0  ;;  %v763_v25 = vadd.f32 %v762_v23, %v1140_v2  ;;  %v693_v43 = vpop.f32.mrb[3].mxu0  ;;  %v764_v8 = vpop.f32.mrb[3].mxu1 }
 0x2f3   :  { %v694_v50 = vadd.f32 %v693_v43, %v1135_v1  ;;  %v765_v38 = vadd.f32 %v764_v8, %v1147_v4 }
 0x2f4   :  { %767 = vst [vmem:[%s1871_s4] sm:$0xff] %v692_v17  ;;  %769 = vst [vmem:[%s1871_s4 + $0x10] sm:$0xff] %v763_v25 }
 0x2f5   :  { %768 = vst [vmem:[%s1871_s4 + $0x8] sm:$0xff] %v694_v50  ;;  %770 = vst [vmem:[%s1871_s4 + $0x18] sm:$0xff] %v765_v38 }

</bundles_post_ra>
